<compile_context>
chip_gen: v7x
topology: tpu7x:2x2x1
jax: 0.10.0
libtpu: 0.0.40
codegen_flags: <defaults>
</compile_context>

<pallas_src>
import functools

import jax
import jax.numpy as jnp
from jax.experimental import pallas as pl
from jax.experimental.pallas import tpu as pltpu

IN_FEATURES = 100
OUT_FEATURES = 100
SUBLANE = 8          # f32 sublane packing
DEFAULT_TB = 4096    # batch-tile rows for the streaming (large-batch) path


def linear_kernel(x_ref, w_ref, b_ref, o_ref):
    # x_ref: (tb, 100), w_ref: (100, 100) in (in, out) order, b_ref: (1, 100)
    acc = jnp.dot(x_ref[...], w_ref[...], preferred_element_type=jnp.float32)
    o_ref[...] = (acc + b_ref[...]).astype(o_ref.dtype)


def prepare_params(weight, bias):
    """One-time parameter prep (done at init, NOT on the per-call path).

    weight: (out, in) = (100, 100) PyTorch layout.
    Returns weight transposed to (in, out) and bias reshaped to (1, out).
    No lane-padding: Mosaic handles the 100-wide K/N dims internally.
    """
    return jnp.asarray(weight).T, jnp.asarray(bias).reshape(1, OUT_FEATURES)


def _round_up(n, m):
    return ((n + m - 1) // m) * m


def _choose_tile(b_pad, tb):
    """Pick a batch tile <= tb, multiple of 8, preferring an even step count
    (so v7x's two TensorCores both get work on the parallel batch axis)."""
    n_steps = pl.cdiv(b_pad, tb)
    if n_steps > 1 and n_steps % 2:
        n_steps += 1
    tile = _round_up(pl.cdiv(b_pad, n_steps), SUBLANE)
    return min(tile, _round_up(tb, SUBLANE))


@functools.partial(jax.jit, static_argnames=("tb",))
def nested_module_forward(x, w_t, b_2d, *, tb=DEFAULT_TB):
    """x: (B, 100) f32; w_t: (100, 100) (in, out); b_2d: (1, 100)."""
    B = x.shape[0]

    if B <= tb:
        # Small batch: no grid, no pipeline bookkeeping, whole arrays resident
        # in VMEM.  No padding, no slicing — x/y keep their native shapes.
        return pl.pallas_call(
            linear_kernel,
            out_shape=jax.ShapeDtypeStruct((B, OUT_FEATURES), x.dtype),
            in_specs=[
                pl.BlockSpec(memory_space=pltpu.MemorySpace.VMEM),
                pl.BlockSpec(memory_space=pltpu.MemorySpace.VMEM),
                pl.BlockSpec(memory_space=pltpu.MemorySpace.VMEM),
            ],
            out_specs=pl.BlockSpec(memory_space=pltpu.MemorySpace.VMEM),
        )(x, w_t, b_2d)

    # Large batch: stream x over a batch grid; weight/bias stay resident.
    # Only round the batch up to the 8-row sublane (not to a multiple of tb).
    b_pad = _round_up(B, SUBLANE)
    if b_pad != B:
        x = jnp.pad(x, ((0, b_pad - B), (0, 0)))

    tile = _choose_tile(b_pad, tb)
    grid = pl.cdiv(b_pad, tile)

    y_p = pl.pallas_call(
        linear_kernel,
        out_shape=jax.ShapeDtypeStruct((b_pad, OUT_FEATURES), x.dtype),
        grid_spec=pltpu.PrefetchScalarGridSpec(
            num_scalar_prefetch=0,
            grid=(grid,),
            in_specs=[
                pl.BlockSpec((tile, IN_FEATURES), lambda i: (i, 0)),
                pl.BlockSpec((IN_FEATURES, OUT_FEATURES), lambda i: (0, 0)),
                pl.BlockSpec((1, OUT_FEATURES), lambda i: (0, 0)),
            ],
            out_specs=pl.BlockSpec((tile, OUT_FEATURES), lambda i: (i, 0)),
        ),
        compiler_params=pltpu.CompilerParams(
            dimension_semantics=("parallel",)),
    )(x, w_t, b_2d)

    # Cheap contiguous row slice only if the batch was row-padded.
    return y_p if b_pad == B else y_p[:B]


if __name__ == "__main__":
    key = jax.random.PRNGKey(0)
    k_x, k_w, k_b, k_x2 = jax.random.split(key, 4)

    # Deterministic params (mimics torch.nn.Linear's U(-1/sqrt(in), 1/sqrt(in)))
    bound = 1.0 / (IN_FEATURES ** 0.5)
    weight = jax.random.uniform(
        k_w, (OUT_FEATURES, IN_FEATURES), jnp.float32, -bound, bound)
    bias = jax.random.uniform(
        k_b, (OUT_FEATURES,), jnp.float32, -bound, bound)

    # One-time prep (pre-transposed weight, 2-D bias).
    w_t, b_2d = prepare_params(weight, bias)
    w_t, b_2d = jax.block_until_ready((w_t, b_2d))

    # --- Small-batch path (no grid, whole arrays in VMEM, no pad/slice) ---
    batch = 8
    x = jax.random.normal(k_x, (batch, IN_FEATURES), jnp.float32)
    y = jax.block_until_ready(nested_module_forward(x, w_t, b_2d))
    y_ref = x @ weight.T + bias
    assert y.shape == (batch, OUT_FEATURES)
    assert jnp.allclose(y, y_ref, atol=1e-4, rtol=1e-4)

    # --- Large-batch path (batch-tiled grid, ragged last block, "parallel") ---
    batch2, tb2 = 300, 128  # small shapes that still exercise the grid path
    x2 = jax.random.normal(k_x2, (batch2, IN_FEATURES), jnp.float32)
    y2 = jax.block_until_ready(nested_module_forward(x2, w_t, b_2d, tb=tb2))
    y2_ref = x2 @ weight.T + bias
    assert y2.shape == (batch2, OUT_FEATURES)
    assert jnp.allclose(y2, y2_ref, atol=1e-4, rtol=1e-4)

    # TODO(synk): matepoint/torch checkpointing only changes backward-pass
    # recomputation; there is nothing to translate for the forward kernel.
    print("KERNEL_OK")
</pallas_src>

<mosaic_0001>
module attributes {stable_mosaic.version = 11 : i64} {
  func.func @linear_kernel(%arg0: memref<8x100xf32, #tpu.memory_space<vmem>>, %arg1: memref<100x100xf32, #tpu.memory_space<vmem>>, %arg2: memref<1x100xf32, #tpu.memory_space<vmem>>, %arg3: memref<8x100xf32, #tpu.memory_space<vmem>>) attributes {dimension_semantics = [], scalar_prefetch = 0 : i64, scratch_operands = 0 : i64, tpu.core_type = #tpu.core_type<tc>} {
    %c0 = arith.constant 0 : index
    %c0_0 = arith.constant 0 : index
    %0 = vector.load %arg0[%c0, %c0_0] : memref<8x100xf32, #tpu.memory_space<vmem>>, vector<8x100xf32>
    %c0_1 = arith.constant 0 : index
    %c0_2 = arith.constant 0 : index
    %1 = vector.load %arg1[%c0_1, %c0_2] : memref<100x100xf32, #tpu.memory_space<vmem>>, vector<100x100xf32>
    %cst = arith.constant dense<0.000000e+00> : vector<8x100xf32>
    %2 = tpu.matmul %0, %1, %cst {dimension_numbers = #tpu.dot_dimension_numbers<[1], [0], [0], [1], [0, 0, 1, 1], [], []>} : vector<8x100xf32>, vector<100x100xf32>, vector<8x100xf32> -> vector<8x100xf32>
    %c0_3 = arith.constant 0 : index
    %c0_4 = arith.constant 0 : index
    %3 = vector.load %arg2[%c0_3, %c0_4] : memref<1x100xf32, #tpu.memory_space<vmem>>, vector<1x100xf32>
    %4 = vector.broadcast %3 : vector<1x100xf32> to vector<8x100xf32>
    %5 = arith.addf %2, %4 : vector<8x100xf32>
    %c0_5 = arith.constant 0 : index
    %c0_6 = arith.constant 0 : index
    %6 = vector.load %arg3[%c0_5, %c0_6] : memref<8x100xf32, #tpu.memory_space<vmem>>, vector<8x100xf32>
    tpu.vector_store %arg3[%c0_5, %c0_6], %5 {strides = array<i32>} : memref<8x100xf32, #tpu.memory_space<vmem>>, vector<8x100xf32>,
    return
  }
}

</mosaic_0001>

<bundles_post_ra>
// kernel: nested_module_forward.1
= control target key start
LH: loop header
LB: loop body
LE: loop exit
PB: predicated region body
PF: predicated region fallthrough
CT: control target
= control target key end

     0   :  { %8 = vsyncpa [#allocation3], 0  ;;  %s375_s0 = inlined_call_operand.hbm [shape: f32[8,100], index: 0, kind: input, shape index: {}]   ;;  %s376_s1 = inlined_call_operand.hbm [shape: f32[100,100], index: 1, kind: input, shape index: {}]   ;;  %s377_s2 = inlined_call_operand.vmem [shape: f32[1,100], index: 2, kind: input, shape index: {}]   ;;  %s378_s3 = inlined_call_operand.hbm [shape: f32[8,100], index: 3, kind: output, shape index: {}]  }
   0x1   :  { %9 = vsyncpa [#allocation6], 0 }
   0x2   :  { %10 = vsyncpa [#allocation4], 0  ;;  %s301_s12 = smov [#allocation2]   ;;  %s302_s14 = smov [#allocation5]  }
   0x3   :  { %s17_s13 = sshll.u32 %s301_s12, 4  ;;  %s26_s15 = sshll.u32 %s302_s14, 4  ;;  %s18_s13 = int_to_ptr.vmem [resolvable:$true] %s17_s13  ;;  %s329_s15 = int_to_ptr.vmem [resolvable:$true] %s26_s15 }
   0x4   :  { %s229_s18 = scalar_lea.hbm %s375_s0, 128 }
   0x5   :  { %p230_p0 = scmp.ne.s32.totalorder %s375_s0, %s229_s18  ;;  %p233_p1 = scmp.lt.u32.totalorder %s229_s18, %s375_s0 }
   0x7   :  { %p235_p2 = pnand %p233_p1, %p230_p0 }
   0x9   :  { %238 = shalt.err (!%p235_p2)
}
   0xa   :  { %s239_s23 = scalar_lea.vmem %s18_s13, 128  ;;  %p244_p4 = scmp.lt.s32.totalorder %s18_s13, %s18_s13 }
   0xb   :  { %p240_p3 = scmp.ne.s32.totalorder %s18_s13, %s239_s23  ;;  %p245_p5 = scmp.lt.s32.totalorder %s239_s23, %s239_s23 }
   0xd   :  { %p246_p6 = por %p245_p5, %p244_p4 }
   0xf   :  { %p247_p7 = pnand %p246_p6, %p240_p3 }
  0x11   :  { %250 = shalt.err (!%p247_p7)
}
  0x12   :  { %20 = dma.hbm_to_vmem [thread:$0]  %s375_s0, 128, %s18_s13, [#allocation3]  }
  0x13   :  { %s251_s28 = scalar_lea.hbm %s376_s1, 1664 }
  0x14   :  { %p252_p8 = scmp.ne.s32.totalorder %s376_s1, %s251_s28  ;;  %p255_p9 = scmp.lt.u32.totalorder %s251_s28, %s376_s1 }
  0x16   :  { %p257_p10 = pnand %p255_p9, %p252_p8 }
  0x18   :  { %260 = shalt.err (!%p257_p10)
}
  0x19   :  { %s261_s6 = scalar_lea.vmem %s329_s15, 1664  ;;  %p266_p12 = scmp.lt.s32.totalorder %s329_s15, %s329_s15 }
  0x1a   :  { %p262_p11 = scmp.ne.s32.totalorder %s329_s15, %s261_s6  ;;  %p267_p13 = scmp.lt.s32.totalorder %s261_s6, %s261_s6 }
  0x1c   :  { %p268_p0 = por %p267_p13, %p266_p12 }
  0x1e   :  { %p269_p1 = pnand %p268_p0, %p262_p11 }
  0x20   :  { %272 = shalt.err (!%p269_p1)
}
  0x21   :  { %s303_s0 = smov 128   ;;  %s304_s7 = smov 8  }
  0x22   :  { %32 = dma.hbm_to_vmem [thread:$0]  %s376_s1, 1664, %s329_s15, [#allocation6], %s303_s0, %s303_s0, %s304_s7  }
  0x23   :  { %295 = dma.done.wait [#allocation3], 128  }
  0x24   :  { %296 = vsyncadd [#allocation3], 4294967168 }
  0x25   :  { %297 = dma.done.wait [#allocation6], 1664  }
  0x26   :  { %298 = vsyncadd [#allocation6], 4294965632  ;;  %v305_v0 = vmov 0.0|0.0   ;;  %vm306_vm0 = vmmov 0   ;;  %v307_v1 = vmov 0.0   ;;  %v42_v2 = vld [vmem:[#allocation5] sm:$0xff] }
  0x27   :  { %203 = vmatprep.subr.bf16.mxu0 %v305_v0  ;;  %200 = vmatprep.mubr.msk.f32.mxu0 %vm306_vm0, %v307_v1  ;;  %v43_v3 = vld [vmem:[#allocation5 + $0x8] sm:$0xff]  ;;  %v44_v4 = vld [vmem:[#allocation5 + $0x10] sm:$0xff]  ;;  %v45_v6 = vld [vmem:[#allocation5 + $0x18] sm:$0xff]  ;;  %vm66_vm1 = vcmask 1043456   ;;  %vm62_vm2 = vcmask 818176   ;;  %s308_s11 = smov [#allocation7]  }
  0x28   :  { %v204_v5 = vpack.c.bf16 %v43_v3, %v42_v2  ;;  %v207_v7 = vpack.c.bf16 %v45_v6, %v44_v4  ;;  %v46_v8 = vld [vmem:[#allocation5 + $0x20] sm:$0xff]  ;;  %v47_v9 = vld [vmem:[#allocation5 + $0x28] sm:$0xff]  ;;  %v48_v11 = vld [vmem:[#allocation5 + $0x30] sm:$0xff]  ;;  %s147_s12 = sshll.u32 %s308_s11, 4  ;;  %s148_s12 = int_to_ptr.vmem [resolvable:$true] %s147_s12 }
  0x29   :  { %v210_v10 = vpack.c.bf16 %v47_v9, %v46_v8  ;;  %v49_v12 = vld [vmem:[#allocation5 + $0x38] sm:$0xff]  ;;  %v50_v14 = vld [vmem:[#allocation5 + $0x40] sm:$0xff]  ;;  %v51_v15 = vld [vmem:[#allocation5 + $0x48] sm:$0xff]  ;;  %s273_s13 = scalar_lea.vmem %s148_s12, 128  ;;  %p278_p3 = scmp.lt.s32.totalorder %s148_s12, %s148_s12 }
  0x2a   :  { %205 = vmatpush3.bf16.msra.mxu0 %v204_v5  ;;  %v213_v13 = vpack.c.bf16 %v49_v12, %v48_v11  ;;  %v216_v16 = vpack.c.bf16 %v51_v15, %v50_v14  ;;  %v52_v17 = vld [vmem:[#allocation5 + $0x50] sm:$0xff]  ;;  %v53_v18 = vld [vmem:[#allocation5 + $0x58] sm:$0xff]  ;;  %v54_v20 = vld [vmem:[#allocation5 + $0x60] sm:$0xf]  ;;  %p274_p2 = scmp.ne.s32.totalorder %s148_s12, %s273_s13  ;;  %p279_p4 = scmp.lt.s32.totalorder %s273_s13, %s273_s13 }
  0x2b   :  { %206 = vmatprep.subr.bf16.mxu0 %v305_v0  ;;  %v219_v19 = vpack.c.bf16 %v53_v18, %v52_v17  ;;  %v41_v21 = vld [vmem:[#allocation2] sm:$0xff] }
  0x2c   :  { %v157_v22 = vld [vmem:[%s377_s2] ss:$0 sm:$0xff]  ;;  %p280_p5 = por %p279_p4, %p278_p3 }
  0x2e   :  { %208 = vmatpush3.bf16.msra.mxu0 %v207_v7  ;;  %p281_p6 = pnand %p280_p5, %p274_p2 }
  0x2f   :  { %209 = vmatprep.subr.bf16.mxu0 %v305_v0 }
  0x32   :  { %211 = vmatpush3.bf16.msra.mxu0 %v210_v10 }
  0x33   :  { %212 = vmatprep.subr.bf16.mxu0 %v305_v0 }
  0x36   :  { %214 = vmatpush3.bf16.msra.mxu0 %v213_v13 }
  0x37   :  { %215 = vmatprep.subr.bf16.mxu0 %v305_v0 }
  0x3a   :  { %217 = vmatpush3.bf16.msra.mxu0 %v216_v16 }
  0x3b   :  { %218 = vmatprep.subr.bf16.mxu0 %v305_v0 }
  0x3e   :  { %220 = vmatpush3.bf16.msra.mxu0 %v219_v19 }
  0x3f   :  { %198 = vmatprep.subr.mxu0 %v307_v1 }
  0x42   :  { %199 = vmatpush3.msk.msra.mxu0 %vm66_vm1, %v54_v20 }
  0x43   :  { %201 = vmatmul.mubr.msk.f32.vlgmr.msra.gmra.mrb[0].mxu0 %vm62_vm2, %v41_v21 }
 0x116   :  { %v136_v23 = vpop.f32.mrb[0].mxu0 }
 0x117   :  { %v137_v24 = vadd.f32 %v157_v22, %v136_v23  ;;  %v202_v25 = vpop.f32.mrb[1].mxu0 }
 0x119   :  { %140 = vst.msk [vmem:[#allocation7] sm:$0xff] %vm62_vm2, %v137_v24 }
 0x11a   :  { %284 = shalt.err (!%p281_p6)
}
 0x11b   :  { %s285_s16 = scalar_lea.hbm %s378_s3, 128 }
 0x11c   :  { %p286_p7 = scmp.ne.s32.totalorder %s378_s3, %s285_s16  ;;  %p289_p8 = scmp.lt.u32.totalorder %s285_s16, %s378_s3 }
 0x11e   :  { %p291_p9 = pnand %p289_p8, %p286_p7 }
 0x120   :  { %294 = shalt.err (!%p291_p9)
}
 0x121   :  { %150 = dma.vmem_to_hbm [thread:$0]  %s148_s12, 128, %s378_s3, [#allocation4]  }
 0x122   :  { %299 = dma.done.wait [#allocation4], 128  }
 0x123   :  { %300 = vsyncadd [#allocation4], 4294967168 }
 0x124   :  { %154 = vsyncpa [#allocation3], 1 }
 0x125   :  { %155 = vsyncpa [#allocation6], 1 }
 0x126   :  { %156 = vsyncpa [#allocation4], 1 }

</bundles_post_ra>
